<compile_context>
chip_gen: v7x
topology: tpu7x:2x2x1
jax: 0.10.0
libtpu: 0.0.40
codegen_flags: <defaults>
</compile_context>

<pallas_src>
import functools
import math

import jax
import jax.numpy as jnp
from jax import lax
from jax.experimental import pallas as pl
from jax.experimental.pallas import tpu as pltpu


# --------------------------------------------------------------------------
# Kernels
# --------------------------------------------------------------------------
def _attn_weights_kernel(*refs, masked):
    """Full-K kernel that also emits the attention weights.

    refs (masked)   : vl_ref, q_ref, k_ref, v_ref, o_ref, w_ref
    refs (unmasked) : q_ref, k_ref, v_ref, o_ref, w_ref

    vl_ref : VMEM (Bb, 1|Q, 1) int32
    q_ref  : VMEM (Bb, Q, D)
    k_ref  : VMEM (Bb, K, D)
    v_ref  : VMEM (Bb, K, V)
    o_ref  : VMEM (Bb, Q, V)
    w_ref  : VMEM (Bb, Q, K)
    """
    if masked:
        vl_ref, q_ref, k_ref, v_ref, o_ref, w_ref = refs
    else:
        q_ref, k_ref, v_ref, o_ref, w_ref = refs

    d = q_ref.shape[-1]
    # Fold 1/sqrt(d) into Q: scales Bb*Q*D elements instead of Bb*Q*K scores.
    scale = jnp.asarray(1.0 / math.sqrt(d), dtype=q_ref.dtype)
    q = q_ref[...] * scale
    k = k_ref[...]
    v = v_ref[...]

    # Batched QK^T: contract D directly (no explicit k.T), f32 accumulation.
    scores = jnp.einsum("bqd,bkd->bqk", q, k,
                        preferred_element_type=jnp.float32)   # (Bb, Q, K) f32

    if masked:
        # d2l semantics: invalid positions -> -1e6, applied in f32.
        vl = vl_ref[...]                                       # (Bb, 1|Q, 1)
        col = lax.broadcasted_iota(jnp.int32, (1, 1, k_ref.shape[1]), 2)
        scores = jnp.where(col < vl, scores, jnp.float32(-1000000.0))

    m = jnp.max(scores, axis=-1, keepdims=True)
    e = jnp.exp(scores - m)
    denom = jnp.sum(e, axis=-1, keepdims=True)
    w = e / denom                                              # exact: sums to 1

    w_ref[...] = w.astype(w_ref.dtype)
    o_ref[...] = jnp.einsum("bqk,bkv->bqv", w.astype(v.dtype), v,
                            preferred_element_type=jnp.float32).astype(o_ref.dtype)


def _attn_flash_kernel(*refs, masked):
    """Output-only kernel: K tiled on the grid, online softmax in scratch.

    refs (masked)   : vl_ref, q_ref, k_ref, v_ref, o_ref, m_sc, l_sc, acc_sc
    refs (unmasked) : q_ref, k_ref, v_ref, o_ref, m_sc, l_sc, acc_sc
    """
    if masked:
        vl_ref, q_ref, k_ref, v_ref, o_ref, m_sc, l_sc, acc_sc = refs
    else:
        q_ref, k_ref, v_ref, o_ref, m_sc, l_sc, acc_sc = refs

    kv = pl.program_id(1)

    @pl.when(kv == 0)
    def _():
        m_sc[...] = jnp.full_like(m_sc, -jnp.inf)
        l_sc[...] = jnp.zeros_like(l_sc)
        acc_sc[...] = jnp.zeros_like(acc_sc)

    d = q_ref.shape[-1]
    scale = jnp.asarray(1.0 / math.sqrt(d), dtype=q_ref.dtype)
    s = jnp.einsum("bqd,bkd->bqk", q_ref[...] * scale, k_ref[...],
                   preferred_element_type=jnp.float32)         # (Bb, Q, Tk) f32

    if masked:
        tk = k_ref.shape[1]
        col = kv * tk + lax.broadcasted_iota(jnp.int32, (1, 1, tk), 2)
        s = jnp.where(col < vl_ref[...], s, jnp.float32(-1000000.0))

    m_new = jnp.maximum(m_sc[...], jnp.max(s, axis=-1, keepdims=True))
    alpha = jnp.exp(m_sc[...] - m_new)
    p = jnp.exp(s - m_new)
    l_sc[...] = alpha * l_sc[...] + jnp.sum(p, axis=-1, keepdims=True)
    acc_sc[...] = alpha * acc_sc[...] + jnp.einsum(
        "bqk,bkv->bqv", p.astype(v_ref.dtype), v_ref[...],
        preferred_element_type=jnp.float32)
    m_sc[...] = m_new

    @pl.when(kv == pl.num_programs(1) - 1)
    def _():
        # approx reciprocal (EUP slot) only on the output-only path.
        o_ref[...] = (acc_sc[...] * pl.reciprocal(l_sc[...], approx=True)
                      ).astype(o_ref.dtype)


# --------------------------------------------------------------------------
# Sizing helpers
# --------------------------------------------------------------------------
def _vmem_capacity_bytes():
    """Per-generation VMEM capacity (v5e/v6e 128 MiB, v7x 64 MiB per core)."""
    try:
        info = pltpu.get_tpu_info()
        cap = getattr(info, "vmem_capacity_bytes", None)
        if cap:
            return int(cap)
    except Exception:
        pass
    return 64 << 20   # conservative fallback (v7x per-core)


def _vmem_budget():
    cap = _vmem_capacity_bytes()
    vmem_limit = max(16 << 20, int(cap * 0.75))       # raised scoped limit
    budget = max(8 << 20, int(vmem_limit * 0.6))      # working-set target
    return vmem_limit, budget


def _pick_batch_block(B, per_batch_bytes, budget_bytes):
    """Largest Bb dividing B whose working set fits the budget, capped so the
    batch grid axis has >= 2 steps when possible (pipelining / megacore)."""
    bb = max(1, min(B, budget_bytes // max(per_batch_bytes, 1)))
    bb = min(bb, max(1, B // 2))
    while B % bb:
        bb -= 1
    return bb


def _pick_k_block(K, target=1024):
    """Largest divisor of K that is a multiple of 8 and <= target; else K."""
    if K <= target:
        return K
    for t in range(target - target % 8, 7, -8):
        if K % t == 0:
            return t
    return K


# --------------------------------------------------------------------------
# Wrapper
# --------------------------------------------------------------------------
def dot_product_attention(queries, keys, values, valid_lens=None,
                          return_weights=True, weights_dtype=None):
    """Pallas implementation of DotProductAttention.forward (eval mode).

    Returns (output, attention_weights).  attention_weights is None when
    return_weights=False (flash path, no (B,Q,K) HBM writeback)."""
    B, Q, D = queries.shape
    _, K, V = values.shape
    assert keys.shape == (B, K, D)
    assert values.shape[0] == B and values.shape[1] == K
    out_dtype = queries.dtype
    if weights_dtype is None:
        weights_dtype = out_dtype
    itemsize = jnp.dtype(out_dtype).itemsize

    masked = valid_lens is not None
    if masked:
        if valid_lens.ndim == 1:
            vl3 = valid_lens.astype(jnp.int32).reshape(B, 1, 1)
        else:
            vl3 = valid_lens.astype(jnp.int32).reshape(B, Q, 1)
        vq = vl3.shape[1]

    vmem_limit, budget = _vmem_budget()

    if return_weights:
        # ------- full-K kernel, emits weights -------
        per_b = (2 * itemsize * (Q * D + K * D + K * V)            # dbl-buf in
                 + 2 * (itemsize * Q * V
                        + jnp.dtype(weights_dtype).itemsize * Q * K)  # dbl-buf out
                 + 4 * 4 * Q * K + 4 * Q * V)                      # f32 temps
        Bb = _pick_batch_block(B, per_b, budget)
        grid = (B // Bb,)

        kern = functools.partial(_attn_weights_kernel, masked=masked)
        in_specs, args = [], []
        if masked:
            in_specs.append(pl.BlockSpec((Bb, vq, 1), lambda b: (b, 0, 0)))
            args.append(vl3)
        in_specs += [
            pl.BlockSpec((Bb, Q, D), lambda b: (b, 0, 0)),
            pl.BlockSpec((Bb, K, D), lambda b: (b, 0, 0)),
            pl.BlockSpec((Bb, K, V), lambda b: (b, 0, 0)),
        ]
        args += [queries, keys, values]

        out, w = pl.pallas_call(
            kern,
            out_shape=(
                jax.ShapeDtypeStruct((B, Q, V), out_dtype),
                jax.ShapeDtypeStruct((B, Q, K), weights_dtype),
            ),
            grid=grid,
            in_specs=in_specs,
            out_specs=(
                pl.BlockSpec((Bb, Q, V), lambda b: (b, 0, 0)),
                pl.BlockSpec((Bb, Q, K), lambda b: (b, 0, 0)),
            ),
            compiler_params=pltpu.CompilerParams(
                dimension_semantics=("parallel",),
                vmem_limit_bytes=vmem_limit),
        )(*args)
        return out, w

    # ------- flash path: K tiled, output only -------
    Tk = _pick_k_block(K)
    per_b = (2 * itemsize * (Q * D + Tk * D + Tk * V)              # dbl-buf in
             + 2 * itemsize * Q * V                                # dbl-buf out
             + 4 * (2 * Q + Q * V)                                 # f32 scratch
             + 3 * 4 * Q * Tk)                                     # f32 temps
    Bb = _pick_batch_block(B, per_b, budget)
    grid = (B // Bb, K // Tk)

    kern = functools.partial(_attn_flash_kernel, masked=masked)
    in_specs, args = [], []
    if masked:
        in_specs.append(pl.BlockSpec((Bb, vq, 1), lambda b, k: (b, 0, 0)))
        args.append(vl3)
    in_specs += [
        pl.BlockSpec((Bb, Q, D), lambda b, k: (b, 0, 0)),
        pl.BlockSpec((Bb, Tk, D), lambda b, k: (b, k, 0)),
        pl.BlockSpec((Bb, Tk, V), lambda b, k: (b, k, 0)),
    ]
    args += [queries, keys, values]

    out = pl.pallas_call(
        kern,
        out_shape=jax.ShapeDtypeStruct((B, Q, V), out_dtype),
        grid=grid,
        in_specs=in_specs,
        out_specs=pl.BlockSpec((Bb, Q, V), lambda b, k: (b, 0, 0)),
        scratch_shapes=[
            pltpu.VMEM((Bb, Q, 1), jnp.float32),   # running max
            pltpu.VMEM((Bb, Q, 1), jnp.float32),   # running denom
            pltpu.VMEM((Bb, Q, V), jnp.float32),   # output accumulator
        ],
        compiler_params=pltpu.CompilerParams(
            dimension_semantics=("parallel", "arbitrary"),
            vmem_limit_bytes=vmem_limit),
    )(*args)
    return out, None


# --------------------------------------------------------------------------
# Reference + test
# --------------------------------------------------------------------------
def _reference(queries, keys, values, valid_lens):
    """Pure-JAX reference mirroring the PyTorch module (1-D valid_lens)."""
    d = queries.shape[-1]
    scores = jnp.einsum("bqd,bkd->bqk", queries, keys) / math.sqrt(d)
    B, Q, K = scores.shape
    col = jnp.arange(K)[None, None, :]
    mask = col < valid_lens[:, None, None]
    scores = jnp.where(mask, scores, -1000000.0)
    w = jax.nn.softmax(scores, axis=-1)
    return jnp.einsum("bqk,bkv->bqv", w, values), w


if __name__ == "__main__":
    # Shapes consistent with the d2l example around this module:
    # queries (2, 1, 2), keys (2, 10, 2), values (2, 10, 4), valid_lens [2, 6]
    B, Q, K, D, V = 2, 1, 10, 2, 4
    key = jax.random.PRNGKey(0)

    queries = jax.random.normal(key, (B, Q, D), dtype=jnp.float32)
    keys = jnp.ones((B, K, D), dtype=jnp.float32)
    values = jnp.tile(jnp.arange(40, dtype=jnp.float32).reshape(1, K, V), (B, 1, 1))
    valid_lens = jnp.array([2, 6], dtype=jnp.int32)

    ref_out, ref_w = _reference(queries, keys, values, valid_lens)
    ref_out_full, ref_w_full = _reference(queries, keys, values,
                                          jnp.full((B,), K, dtype=jnp.int32))

    # 1) weights path, masked (exact reciprocal -> tight weight tolerance).
    out, weights = dot_product_attention(queries, keys, values, valid_lens)
    out = jax.block_until_ready(out)
    weights = jax.block_until_ready(weights)
    assert out.shape == (B, Q, V) and weights.shape == (B, Q, K)
    assert jnp.allclose(weights, ref_w, atol=1e-4, rtol=1e-4)
    assert jnp.allclose(out, ref_out, atol=1e-2, rtol=1e-3)

    # 2) weights path, valid_lens=None (mask block compiled out).
    out2, w2 = dot_product_attention(queries, keys, values, None)
    assert jnp.allclose(jax.block_until_ready(w2), ref_w_full, atol=1e-4, rtol=1e-4)
    assert jnp.allclose(jax.block_until_ready(out2), ref_out_full,
                        atol=1e-2, rtol=1e-3)

    # 3) flash path (no weights writeback), masked. Approx reciprocal on o.
    out3, w3 = dot_product_attention(queries, keys, values, valid_lens,
                                     return_weights=False)
    assert w3 is None
    assert jnp.allclose(jax.block_until_ready(out3), ref_out,
                        atol=1e-2, rtol=5e-3)

    # 4) flash path, unmasked.
    out4, _ = dot_product_attention(queries, keys, values, None,
                                    return_weights=False)
    assert jnp.allclose(jax.block_until_ready(out4), ref_out_full,
                        atol=1e-2, rtol=5e-3)

    print("KERNEL_OK")
</pallas_src>

<mosaic_0001>
module attributes {stable_mosaic.version = 11 : i64} {
  func.func @_attn_weights_kernel(%arg0: i32, %arg1: memref<1x1x1xi32, #tpu.memory_space<vmem>>, %arg2: memref<1x1x2xf32, #tpu.memory_space<vmem>>, %arg3: memref<1x10x2xf32, #tpu.memory_space<vmem>>, %arg4: memref<1x10x4xf32, #tpu.memory_space<vmem>>, %arg5: memref<1x1x4xf32, #tpu.memory_space<vmem>>, %arg6: memref<1x1x10xf32, #tpu.memory_space<vmem>>) attributes {dimension_semantics = [#tpu.dimension_semantics<parallel>], iteration_bounds = array<i64: 2>, scalar_prefetch = 0 : i64, scratch_operands = 0 : i64, tpu.core_type = #tpu.core_type<tc>, window_params = [{transform_indices = @transform_0, window_bounds = array<i64: 1, 1, 1>}, {transform_indices = @transform_1, window_bounds = array<i64: 1, 1, 2>}, {transform_indices = @transform_2, window_bounds = array<i64: 1, 10, 2>}, {transform_indices = @transform_3, window_bounds = array<i64: 1, 10, 4>}, {transform_indices = @transform_4, window_bounds = array<i64: 1, 1, 4>}, {transform_indices = @transform_5, window_bounds = array<i64: 1, 1, 10>}]} {
    %c0 = arith.constant 0 : index
    %c0_0 = arith.constant 0 : index
    %c0_1 = arith.constant 0 : index
    %0 = vector.load %arg2[%c0, %c0_0, %c0_1] : memref<1x1x2xf32, #tpu.memory_space<vmem>>, vector<1x1x2xf32>
    %cst = arith.constant 0.707106769 : f32
    %1 = vector.broadcast %cst : f32 to vector<1x1x2xf32>
    %2 = arith.mulf %0, %1 : vector<1x1x2xf32>
    %c0_2 = arith.constant 0 : index
    %c0_3 = arith.constant 0 : index
    %c0_4 = arith.constant 0 : index
    %3 = vector.load %arg3[%c0_2, %c0_3, %c0_4] : memref<1x10x2xf32, #tpu.memory_space<vmem>>, vector<1x10x2xf32>
    %c0_5 = arith.constant 0 : index
    %c0_6 = arith.constant 0 : index
    %c0_7 = arith.constant 0 : index
    %4 = vector.load %arg4[%c0_5, %c0_6, %c0_7] : memref<1x10x4xf32, #tpu.memory_space<vmem>>, vector<1x10x4xf32>
    "tpu.trace_start"() <{level = 10 : i32, message = "bqd,bkd->bqk"}> : () -> ()
    %cst_8 = arith.constant dense<0.000000e+00> : vector<1x1x10xf32>
    %5 = tpu.matmul %2, %3, %cst_8 {dimension_numbers = #tpu.dot_dimension_numbers<[2], [2], [1], [1], [0, 0, 0, 1, 1, 1], [0], [0]>} : vector<1x1x2xf32>, vector<1x10x2xf32>, vector<1x1x10xf32> -> vector<1x1x10xf32>
    "tpu.trace_stop"() : () -> ()
    %c0_9 = arith.constant 0 : index
    %c0_10 = arith.constant 0 : index
    %c0_11 = arith.constant 0 : index
    %6 = vector.load %arg1[%c0_9, %c0_10, %c0_11] : memref<1x1x1xi32, #tpu.memory_space<vmem>>, vector<1x1x1xi32>
    %7 = tpu.iota {dimensions = array<i32: 2>} : vector<1x1x10xi32>
    %8 = vector.broadcast %6 : vector<1x1x1xi32> to vector<1x1x10xi32>
    %9 = arith.cmpi slt, %7, %8 : vector<1x1x10xi32>
    %cst_12 = arith.constant -1.000000e+06 : f32
    %10 = vector.broadcast %cst_12 : f32 to vector<1x1x10xf32>
    %11 = arith.select %9, %5, %10 : vector<1x1x10xi1>, vector<1x1x10xf32>
    %cst_13 = arith.constant dense<0xFF800000> : vector<1x1xf32>
    %12 = vector.multi_reduction <maximumf>, %11, %cst_13 [2] : vector<1x1x10xf32> to vector<1x1xf32>
    %13 = vector.shape_cast %12 : vector<1x1xf32> to vector<1x1x1xf32>
    %14 = vector.broadcast %13 : vector<1x1x1xf32> to vector<1x1x10xf32>
    %15 = arith.subf %11, %14 : vector<1x1x10xf32>
    %16 = math.exp %15 : vector<1x1x10xf32>
    %cst_14 = arith.constant dense<0.000000e+00> : vector<1x1xf32>
    %17 = vector.multi_reduction <add>, %16, %cst_14 [2] : vector<1x1x10xf32> to vector<1x1xf32>
    %18 = vector.shape_cast %17 : vector<1x1xf32> to vector<1x1x1xf32>
    %19 = vector.broadcast %18 : vector<1x1x1xf32> to vector<1x1x10xf32>
    %20 = arith.divf %16, %19 : vector<1x1x10xf32>
    %c0_15 = arith.constant 0 : index
    %c0_16 = arith.constant 0 : index
    %c0_17 = arith.constant 0 : index
    %21 = vector.load %arg6[%c0_15, %c0_16, %c0_17] : memref<1x1x10xf32, #tpu.memory_space<vmem>>, vector<1x1x10xf32>
    tpu.vector_store %arg6[%c0_15, %c0_16, %c0_17], %20 {strides = array<i32>} : memref<1x1x10xf32, #tpu.memory_space<vmem>>, vector<1x1x10xf32>,
    "tpu.trace_start"() <{level = 10 : i32, message = "bqk,bkv->bqv"}> : () -> ()
    %cst_18 = arith.constant dense<0.000000e+00> : vector<1x1x4xf32>
    %22 = tpu.matmul %20, %4, %cst_18 {dimension_numbers = #tpu.dot_dimension_numbers<[2], [1], [1], [2], [0, 0, 0, 1, 1, 2], [0], [0]>} : vector<1x1x10xf32>, vector<1x10x4xf32>, vector<1x1x4xf32> -> vector<1x1x4xf32>
    "tpu.trace_stop"() : () -> ()
    %c0_19 = arith.constant 0 : index
    %c0_20 = arith.constant 0 : index
    %c0_21 = arith.constant 0 : index
    %23 = vector.load %arg5[%c0_19, %c0_20, %c0_21] : memref<1x1x4xf32, #tpu.memory_space<vmem>>, vector<1x1x4xf32>
    tpu.vector_store %arg5[%c0_19, %c0_20, %c0_21], %22 {strides = array<i32>} : memref<1x1x4xf32, #tpu.memory_space<vmem>>, vector<1x1x4xf32>,
    return
  }
  func.func @transform_0(%arg0: i32) -> (i32, i32, i32) {
    %c0_i32 = arith.constant 0 : i32
    %c0_i32_0 = arith.constant 0 : i32
    %c0_i32_1 = arith.constant 0 : i32
    return %arg0, %c0_i32, %c0_i32_0 : i32, i32, i32
  }
  func.func @transform_1(%arg0: i32) -> (i32, i32, i32) {
    %c0_i32 = arith.constant 0 : i32
    %c0_i32_0 = arith.constant 0 : i32
    %c0_i32_1 = arith.constant 0 : i32
    return %arg0, %c0_i32, %c0_i32_0 : i32, i32, i32
  }
  func.func @transform_2(%arg0: i32) -> (i32, i32, i32) {
    %c0_i32 = arith.constant 0 : i32
    %c0_i32_0 = arith.constant 0 : i32
    %c0_i32_1 = arith.constant 0 : i32
    return %arg0, %c0_i32, %c0_i32_0 : i32, i32, i32
  }
  func.func @transform_3(%arg0: i32) -> (i32, i32, i32) {
    %c0_i32 = arith.constant 0 : i32
    %c0_i32_0 = arith.constant 0 : i32
    %c0_i32_1 = arith.constant 0 : i32
    return %arg0, %c0_i32, %c0_i32_0 : i32, i32, i32
  }
  func.func @transform_4(%arg0: i32) -> (i32, i32, i32) {
    %c0_i32 = arith.constant 0 : i32
    %c0_i32_0 = arith.constant 0 : i32
    %c0_i32_1 = arith.constant 0 : i32
    return %arg0, %c0_i32, %c0_i32_0 : i32, i32, i32
  }
  func.func @transform_5(%arg0: i32) -> (i32, i32, i32) {
    %c0_i32 = arith.constant 0 : i32
    %c0_i32_0 = arith.constant 0 : i32
    %c0_i32_1 = arith.constant 0 : i32
    return %arg0, %c0_i32, %c0_i32_0 : i32, i32, i32
  }
}

</mosaic_0001>

<bundles_post_ra>
// kernel: tpu_custom_call.1
= control target key start
LH: loop header
LB: loop body
LE: loop exit
PB: predicated region body
PF: predicated region fallthrough
CT: control target
= control target key end

     0   :  { %11 = vsyncpa [#allocation3], 0  ;;  %s1001_s0 = inlined_call_operand.vmem [shape: s32[2,1,1], index: 0, kind: input, shape index: {}]   ;;  %s1002_s1 = inlined_call_operand.vmem [shape: f32[2,1,2], index: 1, kind: input, shape index: {}]   ;;  %s1003_s2 = inlined_call_operand.vmem [shape: f32[2,10,2], index: 2, kind: input, shape index: {}]   ;;  %s1004_s3 = inlined_call_operand.vmem [shape: f32[2,10,4], index: 3, kind: input, shape index: {}]   ;;  %s1005_s4 = inlined_call_operand.hbm [shape: f32[2,1,4], index: 4, kind: output, shape index: {0}]   ;;  %s1006_s5 = inlined_call_operand.hbm [shape: f32[2,1,10], index: 5, kind: output, shape index: {1}]  }
   0x1   :  { %13 = vsyncpa [#allocation3 + $0x1], 0 }
   0x2   :  { %14 = vsyncpa [#allocation5], 0 }
   0x3   :  { %16 = vsyncpa [#allocation5 + $0x1], 0  ;;  %s848_s18 = smov 0   ;;  %s850_s19 = smov 0  }
   0x4   :  { %s852_s20 = smov 0   ;;  %s854_s21 = smov 0  }
   0x5 LB: > { %s869_s22 = sadd.s32 4294967295, %s809_s21   ;;  %s614_s23 = sadd.s32 4294967294, %s809_s21   ;;  %s809_s21 = sphi %s854_s21, %s1012_s21   ;;  %s805_s20 = sphi %s852_s20, %s1011_s20   ;;  %s801_s19 = sphi %s850_s19, %s1010_s19   ;;  %s797_s18 = sphi %s848_s18, %s1009_s18  }
   0x6   : > { %s873_s24 = sadd.s32 1, %s809_s21   ;;  %s133_s25 = sadd.s32 1, %s805_s20 }
   0x7   : > { %s130_s26 = ssub.s32 %s809_s21, %s873_s24  ;;  %p143_p0 = scmp.ne.s32.totalorder %s805_s20, %s801_s19 }
   0x8   : > { %p131_p1 = scmp.eq.s32.totalorder %s130_s26, 0  ;;  %p144_p2 = scmp.eq.s32.totalorder %s869_s22, 1 }
   0x9   : > { %p149_p3 = scmp.ne.s32.totalorder %s801_s19, %s797_s18  ;;  %p150_p4 = scmp.eq.s32.totalorder %s614_s23, 1 }
   0xa   : > { %s884_s27 = scalar_select %p131_p1, %s805_s20, %s133_s25  }
   0xb   : > { %p886_p5 = por %p144_p2, %p143_p0  ;;  %p890_p6 = por %p150_p4, %p149_p3 }
   0xc   : > { %p617_p7 = scmp.ge.s32.totalorder %s809_s21, 1  ;;  %p222_p8 = scmp.lt.s32.totalorder %s809_s21, 3 }
   0xe   : > { %p223_p9 = pnand %p617_p7, %p222_p8 }
   0xf   : > { %p264_p10 = scmp.lt.s32.totalorder (!%p223_p9), %s869_s22, 1  ;;  %v811_v0 = vmov (!%p223_p9), 0.0|0.0   ;;  %vm812_vm0 = vmmov (!%p223_p9), 0   ;;  %v813_v1 = vmov (!%p223_p9), 0.0   ;;  %v814_v2 = vmov (!%p223_p9), 0   ;;  %s922_s25 = sand.u32 (!%p223_p9), 1, %s801_s19  }
  0x10   : > { %226 = sbr.rel (%p223_p9) target bundleno = 790 (0x316), region = 36  ;;  %653 = vmatprep.subr.bf16.mxu0 (!%p223_p9), %v811_v0  ;;  %643 = vmatprep.mubr.msk.f32.mxu0 (!%p223_p9), %vm812_vm0, %v813_v1  ;;  %vm286_vm1 = vcmask (!%p223_p9), 15360   ;;  %v367_v9 = vlaneseq (!%p223_p9)  ;;  %vm378_vm4 = vcmask (!%p223_p9), 73728   ;;  %vm395_vm5 = vcmask (!%p223_p9), 1041408   ;;  %s263_s26 = scalar_lea.vmem (!%p223_p9), [#allocation4], %s922_s25 }
  0x11   : > { %710 = vset.pattern.permute.xlu0 (!%p223_p9), %v814_v2  ;;  %657 = vmatprep.subr.bf16.mxu1 (!%p223_p9), %v811_v0  ;;  %vm655_vm2 = vmpackc.low (!%p223_p9), %vm286_vm1, %vm286_vm1  ;;  %vm815_vm6 = vmmov (!%p223_p9), 1   ;;  %vm391_vm8 = vcmask (!%p223_p9), 80896   ;;  %s476_s10 = scalar_lea.sflag (!%p223_p9), [#allocation5], %s922_s25 }
  0x12   : > { %650 = vmatprep.mubr.msk.f32.mxu1 (!%p223_p9), %vm812_vm0, %v813_v1  ;;  %v373_v10 = vshrl.u32 (!%p223_p9), %v367_v9, 7  ;;  %v368_v14 = vand.u32 (!%p223_p9), 127, %v367_v9  ;;  %vm659_vm7 = vmpackc.low (!%p223_p9), %vm395_vm5, %vm815_vm6 }
  0x14   : > { %v374_v11 = vsub.s32 (!%p223_p9), 0, %v373_v10 }
  0x17   : > { %s898_s30 = scalar_select %p264_p10, %s869_s22, 1 }
  0x19   : > { %s631_s6 = sshll.u32 %s898_s30, 4  ;;  %s266_s12 = scalar_lea.vmem %s1001_s0, %s898_s30 }
  0x1a   : > { %s274_s9 = scalar_lea.vmem %s1003_s2, %s631_s6  ;;  %s269_s15 = scalar_lea.vmem %s1002_s1, %s898_s30  ;;  %v366_v6 = vld [vmem:[%s266_s12] sm:$0x1] }
  0x1b   : > { %v282_v3 = vld [vmem:[%s274_s9] sm:$0xff]  ;;  %v283_v4 = vld [vmem:[%s274_s9 + $0x8] sm:$0x3]  ;;  %370 = vperm.xlu0 %710, %v366_v6   ;;  %s279_s23 = scalar_lea.vmem %s1004_s3, %s631_s6  ;;  %s627_s30 = sshll.u32 %s869_s22, 4 }
  0x1c   : > { %v654_v5 = vpack.c.bf16 %v283_v4, %v282_v3  ;;  %v280_v7 = vld [vmem:[%s269_s15] sm:$0x1]  ;;  %v285_v25 = vld [vmem:[%s279_s23 + $0x8] sm:$0x3]  ;;  %s932_s8 = scalar_lea.hbm %s1006_s5, %s627_s30  ;;  %s501_s9 = sshll.u32 %s263_s26, 4  ;;  %s502_s9 = int_to_ptr.vmem [resolvable:$true] %s501_s9 }
  0x1d   : > { %v281_v8 = vmul.f32 0.70710677, %v280_v7  ;;  %v284_v24 = vld [vmem:[%s279_s23] sm:$0xff]  ;;  %s715_s11 = scalar_lea.vmem %s502_s9, 16  ;;  %s816_s12 = smov [#allocation4]  }
  0x1e   : > { %656 = vmatpush3.bf16.xpose.msk.msra.mxu0 %vm655_vm2, %v654_v5  ;;  %v658_v26 = vpack.c.bf16 %v285_v25, %v284_v24  ;;  %p716_p11 = scmp.ne.s32.totalorder %s502_s9, %s715_s11  ;;  %s719_s13 = sshll.u32 %s816_s12, 4  ;;  %s720_s13 = int_to_ptr.vmem [resolvable:$false] %s719_s13 }
  0x1f   : > { %s721_s14 = scalar_lea.vmem %s720_s13, 32  ;;  %p722_p0 = scmp.lt.s32.totalorder %s502_s9, %s720_s13 }
  0x20   : > { %660 = vmatpush3.bf16.msk.msra.mxu1 %vm659_vm7, %v658_v26  ;;  %p717_p12 = pnand %p716_p11, %p886_p5  ;;  %p723_p1 = scmp.lt.s32.totalorder %s721_s14, %s715_s11 }
  0x22   : > { %p718_p13 = pneg %p717_p12  ;;  %p724_p2 = por %p723_p1, %p722_p0 }
  0x24   : > { %p725_p3 = pnand %p724_p2, %p718_p13 }
  0x25   : > { %644 = vmatmul.mubr.msk.f32.vlgmr.msra.gmra.mrb[0].mxu0 %vm286_vm1, %v281_v8 }
  0x9a   : > { %v371_v12 = vpop.permute.xlu0 %370 }
  0x9b   : > { %v375_v13 = vrot.slane %v371_v12, %v374_v11 }
  0x9d   : > { %vm376_vm3 = vcmp.lt.s32.totalorder %v368_v14, %v375_v13 }
  0xf8   : > { %v362_v15 = vpop.f32.mrb[0].mxu0 }
  0xf9   : > { %v377_v16 = vsel %vm376_vm3, %v362_v15, -1000000.0  ;;  %v645_v17 = vpop.f32.mrb[1].mxu0 }
  0xfa   : > { %v379_v18 = vsel %vm378_vm4, %v377_v16, -inf }
  0xfb   : > { %380 = vmax.xlane.f32.xlu0 %v379_v18 }
 0x188   : > { %v381_v19 = vpop.xlane.xlu0 %380 }
 0x189   : > { %v382_v20 = vsub.f32 %v377_v16, %v381_v19 }
 0x18b   : > { %v383_v21 = vmul.f32 1.442695, %v382_v20 }
 0x18d   : > { %711 = vpow2.f32 %v383_v21 }
 0x197   : > { %v712_v22 = vpop.eup %711 }
 0x198   : > { %v385_v23 = vsel %vm378_vm4, %v712_v22, 0.0 }
 0x199   : > { %386 = vadd.xlane.f32.xlu1 %v385_v23 }
 0x226   : > { %v387_v27 = vpop.xlane.xlu1 %386 }
 0x227   : > { %713 = vrcp.f32 %v387_v27 }
 0x231   : > { %v714_v28 = vpop.eup %713 }
 0x232   : > { %v389_v29 = vmul.f32 %v714_v28, %v712_v22 }
 0x234   : > { %651 = vmatmul.mubr.msk.f32.vlgmr.msra.gmra.mrb[0].mxu1 %vm391_vm8, %v389_v29  ;;  %390 = vst.msk [vmem:[%s263_s26] sm:$0x1] %vm378_vm4, %v389_v29 }
 0x235   : > { %728 = shalt.err (!%p725_p3)
}
 0x236   : > { %s729_s15 = scalar_lea.hbm %s932_s8, 16  ;;  %s733_s23 = scalar_lea.hbm %s1006_s5, 32 }
 0x237   : > { %p730_p4 = scmp.ne.s32.totalorder %s932_s8, %s729_s15  ;;  %p734_p9 = scmp.lt.u32.totalorder %s932_s8, %s1006_s5 }
 0x238   : > { %p735_p10 = scmp.lt.u32.totalorder %s733_s23, %s729_s15  ;;  %p737_p12 = scmp.lt.u32.totalorder %s729_s15, %s932_s8 }
 0x239   : > { %p731_p7 = pnand %p730_p4, %p886_p5 }
 0x23a   : > { %p736_p11 = por %p735_p10, %p734_p9 }
 0x23b   : > { %p732_p8 = pneg %p731_p7 }
 0x23c   : > { %p738_p13 = por %p737_p12, %p736_p11 }
 0x23e   : > { %p739_p0 = pnand %p738_p13, %p732_p8 }
 0x240   : > { %742 = shalt.err (!%p739_p0)
}
 0x241   : > { %662 = dma.vmem_to_hbm [thread:$0]  (%p886_p5), %s502_s9, 16, %s932_s8, %s476_s10   ;;  %vm469_vm9 = vcmask 24576  }
 0x242   : > { %s257_s7 = scalar_lea.vmem [#allocation2], %s922_s25  ;;  %s958_s14 = scalar_lea.hbm %s1005_s4, %s627_s30 }
 0x243   : > { %s488_s11 = sshll.u32 %s257_s7, 4  ;;  %s472_s15 = scalar_lea.sflag [#allocation3], %s922_s25  ;;  %s960_s11 = int_to_ptr.vmem [resolvable:$true] %s488_s11 }
 0x244   : > { %s743_s16 = scalar_lea.vmem %s960_s11, 16  ;;  %s817_s22 = smov [#allocation2]  }
 0x245   : > { %p744_p1 = scmp.ne.s32.totalorder %s960_s11, %s743_s16  ;;  %s747_s8 = sshll.u32 %s817_s22, 4  ;;  %s748_s8 = int_to_ptr.vmem [resolvable:$false] %s747_s8 }
 0x246   : > { %s749_s9 = scalar_lea.vmem %s748_s8, 32  ;;  %p750_p4 = scmp.lt.s32.totalorder %s960_s11, %s748_s8 }
 0x247   : > { %p745_p2 = pnand %p744_p1, %p886_p5  ;;  %p751_p7 = scmp.lt.s32.totalorder %s749_s9, %s743_s16 }
 0x249   : > { %p746_p3 = pneg %p745_p2  ;;  %p752_p8 = por %p751_p7, %p750_p4 }
 0x24b   : > { %p753_p9 = pnand %p752_p8, %p746_p3 }
 0x307   : > { %v465_v30 = vpop.f32.mrb[0].mxu1 }
 0x308   : > { %470 = vst.msk [vmem:[%s257_s7] sm:$0x1] %vm469_vm9, %v465_v30  ;;  %v652_v31 = vpop.f32.mrb[1].mxu1 }
 0x309   : > { %756 = shalt.err (!%p753_p9)
}
 0x30a   : > { %s757_s25 = scalar_lea.hbm %s958_s14, 16  ;;  %s761_s17 = scalar_lea.hbm %s1005_s4, 32 }
 0x30b   : > { %p758_p10 = scmp.ne.s32.totalorder %s958_s14, %s757_s25  ;;  %p762_p13 = scmp.lt.u32.totalorder %s958_s14, %s1005_s4 }
 0x30c   : > { %p763_p0 = scmp.lt.u32.totalorder %s761_s17, %s757_s25  ;;  %p765_p2 = scmp.lt.u32.totalorder %s757_s25, %s958_s14 }
 0x30d   : > { %p759_p11 = pnand %p758_p10, %p886_p5 }
 0x30e   : > { %p764_p1 = por %p763_p0, %p762_p13 }
 0x30f   : > { %p760_p12 = pneg %p759_p11 }
 0x310   : > { %p766_p3 = por %p765_p2, %p764_p1 }
 0x312   : > { %p767_p4 = pnand %p766_p3, %p760_p12 }
 0x314   : > { %770 = shalt.err (!%p767_p4)
}
 0x315   : > { %661 = dma.vmem_to_hbm [thread:$0]  (%p886_p5), %s960_s11, 16, %s958_s14, %s472_s15  }
 0x316 PF: > { %p672_p7 = scmp.ge.s32.totalorder %s809_s21, 2  ;;  %s513_s6 = sand.u32 1, %s797_s18  }
 0x317   : > { %s514_s7 = scalar_lea.sflag [#allocation3], %s513_s6 }
 0x318   : > { %p666_p8 = pnand %p672_p7, %p890_p6 }
 0x31a   : > { %788 = dma.done.wait (!%p666_p8), %s514_s7, 16  }
 0x31b   : > { %790 = vsyncadd (!%p666_p8), %s514_s7, 4294967280  ;;  %s522_s12 = scalar_lea.sflag [#allocation5], %s513_s6 }
 0x31c   : > { %792 = dma.done.wait (!%p666_p8), %s522_s12, 16  }
 0x31d   : > { %794 = vsyncadd (!%p666_p8), %s522_s12, 4294967280  ;;  %p19_p5 = scmp.ge.s32.totalorder %s873_s24, 4   ;;  %s1009_s18 = smov %s801_s19 }
 0x31e   : > { %s1010_s19 = smov %s805_s20  ;;  %s1011_s20 = smov %s884_s27 }
 0x31f   : > { %s1012_s21 = smov %s873_s24  ;;  %21 = sbr.rel (!%p19_p5) target bundleno = 5 (0x5), region = 97 }
 0x326   :  { %526 = vsyncpa [#allocation3], 1 }
 0x327   :  { %528 = vsyncpa [#allocation3 + $0x1], 1 }
 0x328   :  { %529 = vsyncpa [#allocation5], 1 }
 0x329   :  { %531 = vsyncpa [#allocation5 + $0x1], 1 }

</bundles_post_ra>
